<compile_context>
chip_gen: v7x
topology: tpu7x:2x2x1
jax: 0.10.0
libtpu: 0.0.40
codegen_flags: <defaults>
</compile_context>

<pallas_src>
import functools

import jax
import jax.numpy as jnp
from jax import lax
from jax.experimental import pallas as pl
from jax.experimental.pallas import tpu as pltpu


def _round_up(x, m):
    return (x + m - 1) // m * m


# ---------------------------------------------------------------------------
# Fused Pallas kernel: DoubleConv on one pooled image (channels on sublanes,
# flattened padded spatial on lanes; each conv = one deep-K MXU matmul).
# ---------------------------------------------------------------------------
def _double_conv_kernel(x_ref, w1_ref, s1_ref, b1_ref,
                        w2_ref, s2_ref, b2_ref, mask_ref, o_ref,
                        col1, col2, *, Wp, L1, L2, Cin, Cmid):
    """x_ref : (1, Cin, LEXT)  pooled image already in zero-extended padded
                               flattened layout (built wrapper-side)
       w1_ref: (Cmid, 9*Cin)   conv1 weights, K ordered (kh, kw, cin)
       w2_ref: (Cout, 9*Cmid)
       s*_ref/b*_ref: (C, 1)   folded BN scale / bias (conv bias included)
       mask_ref: (1, L1)       1.0 on the interior of the padded grid
       o_ref : (1, Cout, L2)   lane-dense output slab; slab[h*Wp + w] = out[h,w]
       col1  : (9*Cin,  L1)    im2col scratch for conv1
       col2  : (9*Cmid, L2)    im2col scratch for conv2
    """
    # ---- conv1: nine contiguous lane-shift taps -> one deep-K matmul.
    for t in range(9):
        kh, kw = divmod(t, 3)
        col1[pl.ds(t * Cin, Cin), :] = x_ref[0, :, pl.ds(kh * Wp + kw, L1)]
    acc1 = jnp.dot(w1_ref[...], col1[...], preferred_element_type=jnp.float32)
    # BN + ReLU; interior mask zeroes the padded-grid border so the masked
    # activation doubles as conv2's zero padding.  y1 never leaves VMEM.
    y1 = jnp.maximum(acc1 * s1_ref[...] + b1_ref[...], 0.0) * mask_ref[...]

    # ---- conv2: taps are static lane-shift slices of y1 (no placement buffer).
    for t in range(9):
        kh, kw = divmod(t, 3)
        off = kh * Wp + kw
        col2[pl.ds(t * Cmid, Cmid), :] = y1[:, off:off + L2]
    acc2 = jnp.dot(w2_ref[...], col2[...], preferred_element_type=jnp.float32)

    # ---- lane-dense slab store (L2 is a multiple of 128); halo stripped in
    #      the wrapper.
    o_ref[0, :, :] = jnp.maximum(acc2 * s2_ref[...] + b2_ref[...], 0.0
                                 ).astype(o_ref.dtype)


def double_conv_pallas(x_pooled_nchw, w1r, s1, b1, w2r, s2, b2):
    """x_pooled_nchw: (N, Cin, H, W) f32; w1r: (Cmid, 9*Cin); w2r: (Cout, 9*Cmid);
       s*/b*: (C, 1) folded BN scale/bias.  Returns (N, Cout, H, W) f32."""
    N, Cin, H, W = x_pooled_nchw.shape
    Cmid, Cout = w1r.shape[0], w2r.shape[0]
    Hp, Wp = H + 2, W + 2
    L = Hp * Wp
    # Output slab must cover indices h*Wp + w (h<H, w<W); lane-round it.
    L2 = _round_up(H * Wp, 128)
    # Conv1 slab must cover conv2's tap reach over the output slab.
    L1 = _round_up(L2 + 2 * Wp + 2, 128)
    # Input must cover conv1's tap reach over the conv1 slab.
    LEXT = _round_up(L1 + 2 * Wp + 2, 128)

    # Zero-extended flattened padded layout, built wrapper-side in one fused
    # XLA pad (image lives at padded-grid rows 2..H+1, cols 2..W+1; the 2-col
    # left gutter absorbs lane wrap of right-edge taps; the tail is zero).
    x_pad = jnp.pad(x_pooled_nchw, ((0, 0), (0, 0), (2, 0), (2, 0)))
    x_ext = jnp.pad(x_pad.reshape(N, Cin, L), ((0, 0), (0, 0), (0, LEXT - L)))

    # Interior mask of the padded grid (zero beyond L too).
    ii = jnp.arange(Hp)
    jj = jnp.arange(Wp)
    interior = (((ii >= 1) & (ii <= H))[:, None]
                & ((jj >= 1) & (jj <= W))[None, :]).reshape(L)
    mask = jnp.zeros((1, L1), jnp.float32).at[0, :L].set(
        interior.astype(jnp.float32))

    kernel = functools.partial(_double_conv_kernel,
                               Wp=Wp, L1=L1, L2=L2, Cin=Cin, Cmid=Cmid)

    out_slab = pl.pallas_call(
        kernel,
        out_shape=jax.ShapeDtypeStruct((N, Cout, L2), jnp.float32),
        grid=(N,),
        in_specs=[
            pl.BlockSpec((1, Cin, LEXT), lambda n: (n, 0, 0)),
            pl.BlockSpec((Cmid, 9 * Cin), lambda n: (0, 0)),
            pl.BlockSpec((Cmid, 1), lambda n: (0, 0)),
            pl.BlockSpec((Cmid, 1), lambda n: (0, 0)),
            pl.BlockSpec((Cout, 9 * Cmid), lambda n: (0, 0)),
            pl.BlockSpec((Cout, 1), lambda n: (0, 0)),
            pl.BlockSpec((Cout, 1), lambda n: (0, 0)),
            pl.BlockSpec((1, L1), lambda n: (0, 0)),
        ],
        out_specs=pl.BlockSpec((1, Cout, L2), lambda n: (n, 0, 0)),
        scratch_shapes=[
            pltpu.VMEM((9 * Cin, L1), jnp.float32),
            pltpu.VMEM((9 * Cmid, L2), jnp.float32),
        ],
        compiler_params=pltpu.CompilerParams(
            dimension_semantics=("parallel",)),
    )(x_ext, w1r, s1, b1, w2r, s2, b2, mask)

    # Strip the halo: slab index h*Wp + w holds the output pixel (h, w).
    out = out_slab[:, :, :H * Wp].reshape(N, Cout, H, Wp)[:, :, :, :W]
    return out


# ---------------------------------------------------------------------------
# Wrapper glue (all NCHW, no transposes)
# ---------------------------------------------------------------------------
def fold_bn(conv_bias, gamma, beta, running_mean, running_var, eps=1e-5):
    scale = gamma / jnp.sqrt(running_var + eps)
    bias = (conv_bias - running_mean) * scale + beta
    return scale, bias


def prep_conv_weight(w_oihw):
    """PyTorch (Cout, Cin, 3, 3) -> (Cout, 9*Cin), K ordered (kh, kw, cin)."""
    O, I, KH, KW = w_oihw.shape
    return jnp.transpose(w_oihw, (0, 2, 3, 1)).reshape(O, KH * KW * I)


def maxpool2x2_nchw(x):
    N, C, H, W = x.shape
    return x.reshape(N, C, H // 2, 2, W // 2, 2).max(axis=(3, 5))


def down_forward(params, x_nchw):
    """Down.forward: MaxPool2d(2) -> DoubleConv.  NCHW in, NCHW out."""
    x = x_nchw.astype(jnp.float32)
    x = maxpool2x2_nchw(x)        # XLA fuses this with the pad that builds x_ext
    s1, b1 = fold_bn(params["b1"], params["g1"], params["be1"],
                     params["m1"], params["v1"])
    s2, b2 = fold_bn(params["b2"], params["g2"], params["be2"],
                     params["m2"], params["v2"])
    w1r = prep_conv_weight(params["w1"])
    w2r = prep_conv_weight(params["w2"])
    Cmid, Cout = w1r.shape[0], w2r.shape[0]
    return double_conv_pallas(
        x, w1r, s1.reshape(Cmid, 1), b1.reshape(Cmid, 1),
        w2r, s2.reshape(Cout, 1), b2.reshape(Cout, 1))


# ---------------------------------------------------------------------------
# Pure-JAX reference (lax.conv / reduce_window) for correctness checking
# ---------------------------------------------------------------------------
def _ref_conv_bn_relu(x, w_oihw, scale, bias):
    y = lax.conv_general_dilated(
        x, w_oihw, window_strides=(1, 1), padding="SAME",
        dimension_numbers=("NCHW", "OIHW", "NCHW"))
    y = y * scale[None, :, None, None] + bias[None, :, None, None]
    return jnp.maximum(y, 0.0)


def down_forward_ref(params, x_nchw):
    x = x_nchw.astype(jnp.float32)
    x = lax.reduce_window(x, -jnp.inf, lax.max,
                          (1, 1, 2, 2), (1, 1, 2, 2), "VALID")
    s1, b1 = fold_bn(params["b1"], params["g1"], params["be1"],
                     params["m1"], params["v1"])
    s2, b2 = fold_bn(params["b2"], params["g2"], params["be2"],
                     params["m2"], params["v2"])
    y = _ref_conv_bn_relu(x, params["w1"], s1, b1)
    y = _ref_conv_bn_relu(y, params["w2"], s2, b2)
    return y


# ---------------------------------------------------------------------------
# Deterministic parameter init: Down(in_channels=4, out_channels=8)
# (DoubleConv => mid_channels = out_channels)
# ---------------------------------------------------------------------------
def init_params(key, in_channels, out_channels):
    mid_channels = out_channels
    ks = jax.random.split(key, 12)
    w1 = 0.1 * jax.random.normal(ks[0], (mid_channels, in_channels, 3, 3), jnp.float32)
    b1 = 0.1 * jax.random.normal(ks[1], (mid_channels,), jnp.float32)
    w2 = 0.1 * jax.random.normal(ks[2], (out_channels, mid_channels, 3, 3), jnp.float32)
    b2 = 0.1 * jax.random.normal(ks[3], (out_channels,), jnp.float32)
    g1 = 1.0 + 0.1 * jax.random.normal(ks[4], (mid_channels,), jnp.float32)
    be1 = 0.1 * jax.random.normal(ks[5], (mid_channels,), jnp.float32)
    m1 = 0.05 * jax.random.normal(ks[6], (mid_channels,), jnp.float32)
    v1 = 1.0 + 0.1 * jax.random.uniform(ks[7], (mid_channels,), jnp.float32)
    g2 = 1.0 + 0.1 * jax.random.normal(ks[8], (out_channels,), jnp.float32)
    be2 = 0.1 * jax.random.normal(ks[9], (out_channels,), jnp.float32)
    m2 = 0.05 * jax.random.normal(ks[10], (out_channels,), jnp.float32)
    v2 = 1.0 + 0.1 * jax.random.uniform(ks[11], (out_channels,), jnp.float32)
    return dict(w1=w1, b1=b1, w2=w2, b2=b2,
                g1=g1, be1=be1, m1=m1, v1=v1,
                g2=g2, be2=be2, m2=m2, v2=v2)


if __name__ == "__main__":
    in_channels, out_channels = 4, 8
    N, H0, W0 = 2, 16, 16
    key = jax.random.PRNGKey(0)
    kp, kx = jax.random.split(key)

    params = init_params(kp, in_channels, out_channels)
    x = jax.random.normal(kx, (N, in_channels, H0, W0), jnp.float32)   # NCHW

    out = jax.jit(functools.partial(down_forward, params))(x)
    out = jax.block_until_ready(out)

    ref = jax.block_until_ready(down_forward_ref(params, x))

    assert out.shape == (N, out_channels, H0 // 2, W0 // 2), out.shape
    assert jnp.allclose(out, ref, atol=1e-4, rtol=1e-4), \
        float(jnp.max(jnp.abs(out - ref)))

    print("KERNEL_OK")
</pallas_src>

<mosaic_0001>
module attributes {stable_mosaic.version = 11 : i64} {
  func.func @_double_conv_kernel(%arg0: i32, %arg1: memref<1x4x384xf32, #tpu.memory_space<vmem>>, %arg2: memref<8x36xf32, #tpu.memory_space<vmem>>, %arg3: memref<8x1xf32, #tpu.memory_space<vmem>>, %arg4: memref<8x1xf32, #tpu.memory_space<vmem>>, %arg5: memref<8x72xf32, #tpu.memory_space<vmem>>, %arg6: memref<8x1xf32, #tpu.memory_space<vmem>>, %arg7: memref<8x1xf32, #tpu.memory_space<vmem>>, %arg8: memref<1x256xf32, #tpu.memory_space<vmem>>, %arg9: memref<1x8x128xf32, #tpu.memory_space<vmem>>, %arg10: memref<36x256xf32, #tpu.memory_space<vmem>>, %arg11: memref<72x128xf32, #tpu.memory_space<vmem>>) attributes {dimension_semantics = [#tpu.dimension_semantics<parallel>], iteration_bounds = array<i64: 2>, scalar_prefetch = 0 : i64, scratch_operands = 2 : i64, tpu.core_type = #tpu.core_type<tc>, window_params = [{transform_indices = @transform_0, window_bounds = array<i64: 1, 4, 384>}, {pipeline_mode = #tpu.pipeline_mode<synchronous>, transform_indices = @transform_1, window_bounds = array<i64: 8, 36>}, {pipeline_mode = #tpu.pipeline_mode<synchronous>, transform_indices = @transform_2, window_bounds = array<i64: 8, 1>}, {pipeline_mode = #tpu.pipeline_mode<synchronous>, transform_indices = @transform_3, window_bounds = array<i64: 8, 1>}, {pipeline_mode = #tpu.pipeline_mode<synchronous>, transform_indices = @transform_4, window_bounds = array<i64: 8, 72>}, {pipeline_mode = #tpu.pipeline_mode<synchronous>, transform_indices = @transform_5, window_bounds = array<i64: 8, 1>}, {pipeline_mode = #tpu.pipeline_mode<synchronous>, transform_indices = @transform_6, window_bounds = array<i64: 8, 1>}, {pipeline_mode = #tpu.pipeline_mode<synchronous>, transform_indices = @transform_7, window_bounds = array<i64: 1, 256>}, {transform_indices = @transform_8, window_bounds = array<i64: 1, 8, 128>}]} {
    %c0 = arith.constant 0 : index
    %c0_0 = arith.constant 0 : index
    %c0_1 = arith.constant 0 : index
    %0 = vector.load %arg1[%c0, %c0_0, %c0_1] : memref<1x4x384xf32, #tpu.memory_space<vmem>>, vector<1x4x256xf32>
    %1 = vector.shape_cast %0 : vector<1x4x256xf32> to vector<4x256xf32>
    %c0_2 = arith.constant 0 : index
    %c0_3 = arith.constant 0 : index
    %2 = vector.load %arg10[%c0_2, %c0_3] : memref<36x256xf32, #tpu.memory_space<vmem>>, vector<4x256xf32>
    tpu.vector_store %arg10[%c0_2, %c0_3], %1 {strides = array<i32>} : memref<36x256xf32, #tpu.memory_space<vmem>>, vector<4x256xf32>,
    %c0_4 = arith.constant 0 : index
    %c0_5 = arith.constant 0 : index
    %c1 = arith.constant 1 : index
    %3 = vector.load %arg1[%c0_4, %c0_5, %c1] : memref<1x4x384xf32, #tpu.memory_space<vmem>>, vector<1x4x256xf32>
    %4 = vector.shape_cast %3 : vector<1x4x256xf32> to vector<4x256xf32>
    %c4 = arith.constant 4 : index
    %c0_6 = arith.constant 0 : index
    %5 = vector.load %arg10[%c4, %c0_6] : memref<36x256xf32, #tpu.memory_space<vmem>>, vector<4x256xf32>
    tpu.vector_store %arg10[%c4, %c0_6], %4 {strides = array<i32>} : memref<36x256xf32, #tpu.memory_space<vmem>>, vector<4x256xf32>,
    %c0_7 = arith.constant 0 : index
    %c0_8 = arith.constant 0 : index
    %c2 = arith.constant 2 : index
    %6 = vector.load %arg1[%c0_7, %c0_8, %c2] : memref<1x4x384xf32, #tpu.memory_space<vmem>>, vector<1x4x256xf32>
    %7 = vector.shape_cast %6 : vector<1x4x256xf32> to vector<4x256xf32>
    %c8 = arith.constant 8 : index
    %c0_9 = arith.constant 0 : index
    %8 = vector.load %arg10[%c8, %c0_9] : memref<36x256xf32, #tpu.memory_space<vmem>>, vector<4x256xf32>
    tpu.vector_store %arg10[%c8, %c0_9], %7 {strides = array<i32>} : memref<36x256xf32, #tpu.memory_space<vmem>>, vector<4x256xf32>,
    %c0_10 = arith.constant 0 : index
    %c0_11 = arith.constant 0 : index
    %c10 = arith.constant 10 : index
    %9 = vector.load %arg1[%c0_10, %c0_11, %c10] : memref<1x4x384xf32, #tpu.memory_space<vmem>>, vector<1x4x256xf32>
    %10 = vector.shape_cast %9 : vector<1x4x256xf32> to vector<4x256xf32>
    %c12 = arith.constant 12 : index
    %c0_12 = arith.constant 0 : index
    %11 = vector.load %arg10[%c12, %c0_12] : memref<36x256xf32, #tpu.memory_space<vmem>>, vector<4x256xf32>
    tpu.vector_store %arg10[%c12, %c0_12], %10 {strides = array<i32>} : memref<36x256xf32, #tpu.memory_space<vmem>>, vector<4x256xf32>,
    %c0_13 = arith.constant 0 : index
    %c0_14 = arith.constant 0 : index
    %c11 = arith.constant 11 : index
    %12 = vector.load %arg1[%c0_13, %c0_14, %c11] : memref<1x4x384xf32, #tpu.memory_space<vmem>>, vector<1x4x256xf32>
    %13 = vector.shape_cast %12 : vector<1x4x256xf32> to vector<4x256xf32>
    %c16 = arith.constant 16 : index
    %c0_15 = arith.constant 0 : index
    %14 = vector.load %arg10[%c16, %c0_15] : memref<36x256xf32, #tpu.memory_space<vmem>>, vector<4x256xf32>
    tpu.vector_store %arg10[%c16, %c0_15], %13 {strides = array<i32>} : memref<36x256xf32, #tpu.memory_space<vmem>>, vector<4x256xf32>,
    %c0_16 = arith.constant 0 : index
    %c0_17 = arith.constant 0 : index
    %c12_18 = arith.constant 12 : index
    %15 = vector.load %arg1[%c0_16, %c0_17, %c12_18] : memref<1x4x384xf32, #tpu.memory_space<vmem>>, vector<1x4x256xf32>
    %16 = vector.shape_cast %15 : vector<1x4x256xf32> to vector<4x256xf32>
    %c20 = arith.constant 20 : index
    %c0_19 = arith.constant 0 : index
    %17 = vector.load %arg10[%c20, %c0_19] : memref<36x256xf32, #tpu.memory_space<vmem>>, vector<4x256xf32>
    tpu.vector_store %arg10[%c20, %c0_19], %16 {strides = array<i32>} : memref<36x256xf32, #tpu.memory_space<vmem>>, vector<4x256xf32>,
    %c0_20 = arith.constant 0 : index
    %c0_21 = arith.constant 0 : index
    %c20_22 = arith.constant 20 : index
    %18 = vector.load %arg1[%c0_20, %c0_21, %c20_22] : memref<1x4x384xf32, #tpu.memory_space<vmem>>, vector<1x4x256xf32>
    %19 = vector.shape_cast %18 : vector<1x4x256xf32> to vector<4x256xf32>
    %c24 = arith.constant 24 : index
    %c0_23 = arith.constant 0 : index
    %20 = vector.load %arg10[%c24, %c0_23] : memref<36x256xf32, #tpu.memory_space<vmem>>, vector<4x256xf32>
    tpu.vector_store %arg10[%c24, %c0_23], %19 {strides = array<i32>} : memref<36x256xf32, #tpu.memory_space<vmem>>, vector<4x256xf32>,
    %c0_24 = arith.constant 0 : index
    %c0_25 = arith.constant 0 : index
    %c21 = arith.constant 21 : index
    %21 = vector.load %arg1[%c0_24, %c0_25, %c21] : memref<1x4x384xf32, #tpu.memory_space<vmem>>, vector<1x4x256xf32>
    %22 = vector.shape_cast %21 : vector<1x4x256xf32> to vector<4x256xf32>
    %c28 = arith.constant 28 : index
    %c0_26 = arith.constant 0 : index
    %23 = vector.load %arg10[%c28, %c0_26] : memref<36x256xf32, #tpu.memory_space<vmem>>, vector<4x256xf32>
    tpu.vector_store %arg10[%c28, %c0_26], %22 {strides = array<i32>} : memref<36x256xf32, #tpu.memory_space<vmem>>, vector<4x256xf32>,
    %c0_27 = arith.constant 0 : index
    %c0_28 = arith.constant 0 : index
    %c22 = arith.constant 22 : index
    %24 = vector.load %arg1[%c0_27, %c0_28, %c22] : memref<1x4x384xf32, #tpu.memory_space<vmem>>, vector<1x4x256xf32>
    %25 = vector.shape_cast %24 : vector<1x4x256xf32> to vector<4x256xf32>
    %c32 = arith.constant 32 : index
    %c0_29 = arith.constant 0 : index
    %26 = vector.load %arg10[%c32, %c0_29] : memref<36x256xf32, #tpu.memory_space<vmem>>, vector<4x256xf32>
    tpu.vector_store %arg10[%c32, %c0_29], %25 {strides = array<i32>} : memref<36x256xf32, #tpu.memory_space<vmem>>, vector<4x256xf32>,
    %c0_30 = arith.constant 0 : index
    %c0_31 = arith.constant 0 : index
    %27 = vector.load %arg2[%c0_30, %c0_31] : memref<8x36xf32, #tpu.memory_space<vmem>>, vector<8x36xf32>
    %c0_32 = arith.constant 0 : index
    %c0_33 = arith.constant 0 : index
    %28 = vector.load %arg10[%c0_32, %c0_33] : memref<36x256xf32, #tpu.memory_space<vmem>>, vector<36x256xf32>
    %cst = arith.constant dense<0.000000e+00> : vector<8x256xf32>
    %29 = tpu.matmul %27, %28, %cst {dimension_numbers = #tpu.dot_dimension_numbers<[1], [0], [0], [1], [0, 0, 1, 1], [], []>} : vector<8x36xf32>, vector<36x256xf32>, vector<8x256xf32> -> vector<8x256xf32>
    %c0_34 = arith.constant 0 : index
    %c0_35 = arith.constant 0 : index
    %30 = vector.load %arg3[%c0_34, %c0_35] : memref<8x1xf32, #tpu.memory_space<vmem>>, vector<8x1xf32>
    %31 = vector.broadcast %30 : vector<8x1xf32> to vector<8x256xf32>
    %32 = arith.mulf %29, %31 : vector<8x256xf32>
    %c0_36 = arith.constant 0 : index
    %c0_37 = arith.constant 0 : index
    %33 = vector.load %arg4[%c0_36, %c0_37] : memref<8x1xf32, #tpu.memory_space<vmem>>, vector<8x1xf32>
    %34 = vector.broadcast %33 : vector<8x1xf32> to vector<8x256xf32>
    %35 = arith.addf %32, %34 : vector<8x256xf32>
    %cst_38 = arith.constant 0.000000e+00 : f32
    %36 = vector.broadcast %cst_38 : f32 to vector<8x256xf32>
    %37 = arith.maximumf %35, %36 : vector<8x256xf32>
    %c0_39 = arith.constant 0 : index
    %c0_40 = arith.constant 0 : index
    %38 = vector.load %arg8[%c0_39, %c0_40] : memref<1x256xf32, #tpu.memory_space<vmem>>, vector<1x256xf32>
    %39 = vector.broadcast %38 : vector<1x256xf32> to vector<8x256xf32>
    %40 = arith.mulf %37, %39 : vector<8x256xf32>
    %41 = vector.extract_strided_slice %40 {offsets = [0, 0], sizes = [8, 128], strides = [1, 1]} : vector<8x256xf32> to vector<8x128xf32>
    %c0_41 = arith.constant 0 : index
    %c0_42 = arith.constant 0 : index
    %42 = vector.load %arg11[%c0_41, %c0_42] : memref<72x128xf32, #tpu.memory_space<vmem>>, vector<8x128xf32>
    tpu.vector_store %arg11[%c0_41, %c0_42], %41 {strides = array<i32>} : memref<72x128xf32, #tpu.memory_space<vmem>>, vector<8x128xf32>,
    %43 = vector.extract_strided_slice %40 {offsets = [0, 1], sizes = [8, 128], strides = [1, 1]} : vector<8x256xf32> to vector<8x128xf32>
    %c8_43 = arith.constant 8 : index
    %c0_44 = arith.constant 0 : index
    %44 = vector.load %arg11[%c8_43, %c0_44] : memref<72x128xf32, #tpu.memory_space<vmem>>, vector<8x128xf32>
    tpu.vector_store %arg11[%c8_43, %c0_44], %43 {strides = array<i32>} : memref<72x128xf32, #tpu.memory_space<vmem>>, vector<8x128xf32>,
    %45 = vector.extract_strided_slice %40 {offsets = [0, 2], sizes = [8, 128], strides = [1, 1]} : vector<8x256xf32> to vector<8x128xf32>
    %c16_45 = arith.constant 16 : index
    %c0_46 = arith.constant 0 : index
    %46 = vector.load %arg11[%c16_45, %c0_46] : memref<72x128xf32, #tpu.memory_space<vmem>>, vector<8x128xf32>
    tpu.vector_store %arg11[%c16_45, %c0_46], %45 {strides = array<i32>} : memref<72x128xf32, #tpu.memory_space<vmem>>, vector<8x128xf32>,
    %47 = vector.extract_strided_slice %40 {offsets = [0, 10], sizes = [8, 128], strides = [1, 1]} : vector<8x256xf32> to vector<8x128xf32>
    %c24_47 = arith.constant 24 : index
    %c0_48 = arith.constant 0 : index
    %48 = vector.load %arg11[%c24_47, %c0_48] : memref<72x128xf32, #tpu.memory_space<vmem>>, vector<8x128xf32>
    tpu.vector_store %arg11[%c24_47, %c0_48], %47 {strides = array<i32>} : memref<72x128xf32, #tpu.memory_space<vmem>>, vector<8x128xf32>,
    %49 = vector.extract_strided_slice %40 {offsets = [0, 11], sizes = [8, 128], strides = [1, 1]} : vector<8x256xf32> to vector<8x128xf32>
    %c32_49 = arith.constant 32 : index
    %c0_50 = arith.constant 0 : index
    %50 = vector.load %arg11[%c32_49, %c0_50] : memref<72x128xf32, #tpu.memory_space<vmem>>, vector<8x128xf32>
    tpu.vector_store %arg11[%c32_49, %c0_50], %49 {strides = array<i32>} : memref<72x128xf32, #tpu.memory_space<vmem>>, vector<8x128xf32>,
    %51 = vector.extract_strided_slice %40 {offsets = [0, 12], sizes = [8, 128], strides = [1, 1]} : vector<8x256xf32> to vector<8x128xf32>
    %c40 = arith.constant 40 : index
    %c0_51 = arith.constant 0 : index
    %52 = vector.load %arg11[%c40, %c0_51] : memref<72x128xf32, #tpu.memory_space<vmem>>, vector<8x128xf32>
    tpu.vector_store %arg11[%c40, %c0_51], %51 {strides = array<i32>} : memref<72x128xf32, #tpu.memory_space<vmem>>, vector<8x128xf32>,
    %53 = vector.extract_strided_slice %40 {offsets = [0, 20], sizes = [8, 128], strides = [1, 1]} : vector<8x256xf32> to vector<8x128xf32>
    %c48 = arith.constant 48 : index
    %c0_52 = arith.constant 0 : index
    %54 = vector.load %arg11[%c48, %c0_52] : memref<72x128xf32, #tpu.memory_space<vmem>>, vector<8x128xf32>
    tpu.vector_store %arg11[%c48, %c0_52], %53 {strides = array<i32>} : memref<72x128xf32, #tpu.memory_space<vmem>>, vector<8x128xf32>,
    %55 = vector.extract_strided_slice %40 {offsets = [0, 21], sizes = [8, 128], strides = [1, 1]} : vector<8x256xf32> to vector<8x128xf32>
    %c56 = arith.constant 56 : index
    %c0_53 = arith.constant 0 : index
    %56 = vector.load %arg11[%c56, %c0_53] : memref<72x128xf32, #tpu.memory_space<vmem>>, vector<8x128xf32>
    tpu.vector_store %arg11[%c56, %c0_53], %55 {strides = array<i32>} : memref<72x128xf32, #tpu.memory_space<vmem>>, vector<8x128xf32>,
    %57 = vector.extract_strided_slice %40 {offsets = [0, 22], sizes = [8, 128], strides = [1, 1]} : vector<8x256xf32> to vector<8x128xf32>
    %c64 = arith.constant 64 : index
    %c0_54 = arith.constant 0 : index
    %58 = vector.load %arg11[%c64, %c0_54] : memref<72x128xf32, #tpu.memory_space<vmem>>, vector<8x128xf32>
    tpu.vector_store %arg11[%c64, %c0_54], %57 {strides = array<i32>} : memref<72x128xf32, #tpu.memory_space<vmem>>, vector<8x128xf32>,
    %c0_55 = arith.constant 0 : index
    %c0_56 = arith.constant 0 : index
    %59 = vector.load %arg5[%c0_55, %c0_56] : memref<8x72xf32, #tpu.memory_space<vmem>>, vector<8x72xf32>
    %c0_57 = arith.constant 0 : index
    %c0_58 = arith.constant 0 : index
    %60 = vector.load %arg11[%c0_57, %c0_58] : memref<72x128xf32, #tpu.memory_space<vmem>>, vector<72x128xf32>
    %cst_59 = arith.constant dense<0.000000e+00> : vector<8x128xf32>
    %61 = tpu.matmul %59, %60, %cst_59 {dimension_numbers = #tpu.dot_dimension_numbers<[1], [0], [0], [1], [0, 0, 1, 1], [], []>} : vector<8x72xf32>, vector<72x128xf32>, vector<8x128xf32> -> vector<8x128xf32>
    %c0_60 = arith.constant 0 : index
    %c0_61 = arith.constant 0 : index
    %62 = vector.load %arg6[%c0_60, %c0_61] : memref<8x1xf32, #tpu.memory_space<vmem>>, vector<8x1xf32>
    %63 = vector.broadcast %62 : vector<8x1xf32> to vector<8x128xf32>
    %64 = arith.mulf %61, %63 : vector<8x128xf32>
    %c0_62 = arith.constant 0 : index
    %c0_63 = arith.constant 0 : index
    %65 = vector.load %arg7[%c0_62, %c0_63] : memref<8x1xf32, #tpu.memory_space<vmem>>, vector<8x1xf32>
    %66 = vector.broadcast %65 : vector<8x1xf32> to vector<8x128xf32>
    %67 = arith.addf %64, %66 : vector<8x128xf32>
    %cst_64 = arith.constant 0.000000e+00 : f32
    %68 = vector.broadcast %cst_64 : f32 to vector<8x128xf32>
    %69 = arith.maximumf %67, %68 : vector<8x128xf32>
    %c0_65 = arith.constant 0 : index
    %c0_66 = arith.constant 0 : index
    %c0_67 = arith.constant 0 : index
    %70 = vector.load %arg9[%c0_65, %c0_66, %c0_67] : memref<1x8x128xf32, #tpu.memory_space<vmem>>, vector<1x8x128xf32>
    %71 = vector.shape_cast %70 : vector<1x8x128xf32> to vector<8x128xf32>
    %72 = vector.shape_cast %69 : vector<8x128xf32> to vector<1x8x128xf32>
    tpu.vector_store %arg9[%c0_65, %c0_66, %c0_67], %72 {strides = array<i32>} : memref<1x8x128xf32, #tpu.memory_space<vmem>>, vector<1x8x128xf32>,
    return
  }
  func.func @transform_0(%arg0: i32) -> (i32, i32, i32) {
    %c0_i32 = arith.constant 0 : i32
    %c0_i32_0 = arith.constant 0 : i32
    %c0_i32_1 = arith.constant 0 : i32
    return %arg0, %c0_i32, %c0_i32_0 : i32, i32, i32
  }
  func.func @transform_1(%arg0: i32) -> (i32, i32) {
    %c0_i32 = arith.constant 0 : i32
    %c0_i32_0 = arith.constant 0 : i32
    %c0_i32_1 = arith.constant 0 : i32
    return %c0_i32, %c0_i32_0 : i32, i32
  }
  func.func @transform_2(%arg0: i32) -> (i32, i32) {
    %c0_i32 = arith.constant 0 : i32
    %c0_i32_0 = arith.constant 0 : i32
    %c0_i32_1 = arith.constant 0 : i32
    return %c0_i32, %c0_i32_0 : i32, i32
  }
  func.func @transform_3(%arg0: i32) -> (i32, i32) {
    %c0_i32 = arith.constant 0 : i32
    %c0_i32_0 = arith.constant 0 : i32
    %c0_i32_1 = arith.constant 0 : i32
    return %c0_i32, %c0_i32_0 : i32, i32
  }
  func.func @transform_4(%arg0: i32) -> (i32, i32) {
    %c0_i32 = arith.constant 0 : i32
    %c0_i32_0 = arith.constant 0 : i32
    %c0_i32_1 = arith.constant 0 : i32
    return %c0_i32, %c0_i32_0 : i32, i32
  }
  func.func @transform_5(%arg0: i32) -> (i32, i32) {
    %c0_i32 = arith.constant 0 : i32
    %c0_i32_0 = arith.constant 0 : i32
    %c0_i32_1 = arith.constant 0 : i32
    return %c0_i32, %c0_i32_0 : i32, i32
  }
  func.func @transform_6(%arg0: i32) -> (i32, i32) {
    %c0_i32 = arith.constant 0 : i32
    %c0_i32_0 = arith.constant 0 : i32
    %c0_i32_1 = arith.constant 0 : i32
    return %c0_i32, %c0_i32_0 : i32, i32
  }
  func.func @transform_7(%arg0: i32) -> (i32, i32) {
    %c0_i32 = arith.constant 0 : i32
    %c0_i32_0 = arith.constant 0 : i32
    %c0_i32_1 = arith.constant 0 : i32
    return %c0_i32, %c0_i32_0 : i32, i32
  }
  func.func @transform_8(%arg0: i32) -> (i32, i32, i32) {
    %c0_i32 = arith.constant 0 : i32
    %c0_i32_0 = arith.constant 0 : i32
    %c0_i32_1 = arith.constant 0 : i32
    return %arg0, %c0_i32, %c0_i32_0 : i32, i32, i32
  }
}

</mosaic_0001>

<bundles_post_ra>
// kernel: down_forward.1
= control target key start
LH: loop header
LB: loop body
LE: loop exit
PB: predicated region body
PF: predicated region fallthrough
CT: control target
= control target key end

     0   :  { %s988_s27 = smov 0   ;;  %s1101_s0 = inlined_call_operand.vmem [shape: f32[2,4,384], index: 0, kind: input, shape index: {}]   ;;  %s1102_s1 = inlined_call_operand.vmem [shape: f32[8,36], index: 1, kind: input, shape index: {}]   ;;  %s1103_s2 = inlined_call_operand.vmem [shape: f32[8,1], index: 2, kind: input, shape index: {}]   ;;  %s1104_s3 = inlined_call_operand.vmem [shape: f32[8,1], index: 3, kind: input, shape index: {}]   ;;  %s1105_s4 = inlined_call_operand.vmem [shape: f32[8,72], index: 4, kind: input, shape index: {}]   ;;  %s1106_s5 = inlined_call_operand.vmem [shape: f32[8,1], index: 5, kind: input, shape index: {}]   ;;  %s1107_s6 = inlined_call_operand.vmem [shape: f32[8,1], index: 6, kind: input, shape index: {}]   ;;  %s1108_s7 = inlined_call_operand.vmem [shape: f32[1,256], index: 7, kind: input, shape index: {}]   ;;  %s1109_s8 = inlined_call_operand.vmem [shape: f32[2,8,128], index: 8, kind: output, shape index: {}]  }
   0x1 LB: > { %s795_s28 = sadd.s32 4294967295, %s929_s27   ;;  %p799_p0 = scmp.ge.s32.totalorder %s929_s27, 1  ;;  %s929_s27 = sphi %s988_s27, %s18_s27  }
   0x2   : > { %p262_p1 = scmp.lt.s32.totalorder %s929_s27, 3 }
   0x4   : > { %p263_p2 = pnand %p799_p0, %p262_p1 }
   0x5   : > { %p295_p3 = scmp.lt.s32.totalorder (!%p263_p2), %s795_s28, 1  ;;  %s931_s11 = smov (!%p263_p2), 126   ;;  %v939_v11 = vmov (!%p263_p2), 0.0   ;;  %v940_v12 = vmov (!%p263_p2), 0   ;;  %v551_v13 = vld [vmem:[%s1103_s2] sm:$0xff] (!%p263_p2)  ;;  %vm340_vm0 = vcmask (!%p263_p2), 1031168  }
   0x6   : > { %266 = sbr.rel (%p263_p2) target bundleno = 768 (0x300), region = 52  ;;  %s932_s12 = smov (!%p263_p2), 127   ;;  %544 = vmatprep.mubr.f32.mxu0 (!%p263_p2), %v939_v11  ;;  %880 = vset.pattern.permute.xlu0 (!%p263_p2), %v940_v12  ;;  %v559_v14 = vld [vmem:[%s1104_s3] sm:$0xff] (!%p263_p2)  ;;  %vm359_vm1 = vcmask (!%p263_p2), 965632   ;;  %vm322_vm2 = vcmask (!%p263_p2), 1039360   ;;  %vm377_vm3 = vcmask (!%p263_p2), 957440  }
   0x7   : > { %s933_s13 = smov (!%p263_p2), 118   ;;  %s934_s14 = smov (!%p263_p2), 117   ;;  %881 = vset.pattern.permute.xlu1 (!%p263_p2), %v940_v12  ;;  %vm396_vm4 = vcmask (!%p263_p2), 949248   ;;  %vm414_vm5 = vcmask (!%p263_p2), 883712   ;;  %vm433_vm6 = vcmask (!%p263_p2), 875520   ;;  %vm451_vm7 = vcmask (!%p263_p2), 867328  }
   0x8   : > { %s935_s15 = smov (!%p263_p2), 116   ;;  %s936_s16 = smov (!%p263_p2), 108   ;;  %vm473_vm8 = vcmask (!%p263_p2), 1043456   ;;  %vm469_vm9 = vcmask (!%p263_p2), 293888   ;;  %v569_v12 = vld [vmem:[%s1108_s7] sm:$0x3] (!%p263_p2) }
   0x9   : > { %s937_s17 = smov (!%p263_p2), 107   ;;  %s938_s18 = smov (!%p263_p2), 106   ;;  %vm942_vm10 = vmmov (!%p263_p2), 0   ;;  %vm652_vm11 = vcmask (!%p263_p2), 588800  }
   0xa   : > { %836 = vmatprep.mubr.msk.f32.mxu1 (!%p263_p2), %vm942_vm10, %v939_v11 }
   0xd   : > { %s1111_s28 = smov (!%p295_p3, %s795_s28), 1 }
   0xe   : > { %s859_s29 = smul.u32 12, %s1111_s28 }
  0x10   : > { %s1002_s10 = scalar_lea.vmem %s1101_s0, %s859_s29 }
  0x11   : > { %v330_v0 = vld [vmem:[%s1002_s10 + $0x8] sm:$0xf]  ;;  %v310_v1 = vld [vmem:[%s1002_s10] sm:$0xff] }
  0x12   : > { %338 = vrot.lane.b32.xlu1 %v330_v0, %s931_s11  ;;  %318 = vrot.lane.b32.xlu0 %v310_v1, %s932_s12  ;;  %v333_v2 = vcombine.high %v310_v1, %v310_v1  ;;  %308 = vst [vmem:[#allocation2] sm:$0xf] %v310_v1  ;;  %v919_v3 = vld [vmem:[%s1002_s10 + $0x8] ss:$0 sps:$4 sm:$0xff]   ;;  %v314_v5 = vcombine.low %v310_v1, %v310_v1 }
  0x13   : > { %v920_v4 = vld [vmem:[%s1002_s10 + $0x8] ss:$0 sps:$4 sm:$0xff]  }
  0x14   : > { %309 = vst [vmem:[#allocation2 + $0x8] sm:$0xf] %v333_v2  ;;  %v367_v6 = vld [vmem:[%s1002_s10 + $0x8] sm:$0xf] }
  0x15   : > { %v921_v7 = vld [vmem:[%s1002_s10 + $0x8] ss:$0 sps:$4 sm:$0xff]  }
  0x16   : > { %336 = vrot.lane.b32.xlu1 %v333_v2, %s931_s11  ;;  %355 = vrot.lane.b32.xlu0 %v310_v1, %s933_s13  ;;  %v404_v8 = vld [vmem:[%s1002_s10 + $0x8] sm:$0xf] }
  0x17   : > { %v922_v9 = vld [vmem:[%s1002_s10 + $0x8] ss:$0 sps:$4 sm:$0xff]  }
  0x18   : > { %v441_v10 = vld [vmem:[%s1002_s10 + $0x8] sm:$0xf] }
  0x1a   : > { %357 = vrot.lane.b32.xlu1 %v919_v3, %s933_s13  ;;  %320 = vrot.lane.b32.xlu0 %v920_v4, %s932_s12  ;;  %v458_v4 = vld [vmem:[%s1102_s1] sm:$0xff] }
  0x1e   : > { %334 = vrot.lane.b32.xlu1 %v310_v1, %s931_s11  ;;  %316 = vrot.lane.b32.xlu0 %v314_v5, %s932_s12 }
  0x22   : > { %373 = vrot.lane.b32.xlu1 %v333_v2, %s934_s14  ;;  %353 = vrot.lane.b32.xlu0 %v314_v5, %s933_s13 }
  0x26   : > { %392 = vrot.lane.b32.xlu1 %v310_v1, %s935_s15  ;;  %375 = vrot.lane.b32.xlu0 %v367_v6, %s934_s14  ;;  %v571_v6 = vlaneseq }
  0x2a   : > { %410 = vrot.lane.b32.xlu1 %v333_v2, %s936_s16  ;;  %394 = vrot.lane.b32.xlu0 %v921_v7, %s935_s15  ;;  %v572_v7 = vshrl.u32 %v571_v6, 7 }
  0x2e   : > { %429 = vrot.lane.b32.xlu1 %v310_v1, %s937_s17  ;;  %412 = vrot.lane.b32.xlu0 %v404_v8, %s936_s16 }
  0x32   : > { %371 = vrot.lane.b32.xlu1 %v310_v1, %s934_s14  ;;  %431 = vrot.lane.b32.xlu0 %v922_v9, %s937_s17  ;;  %v573_v9 = vsub.s32 0, %v572_v7 }
  0x36   : > { %408 = vrot.lane.b32.xlu1 %v310_v1, %s936_s16  ;;  %390 = vrot.lane.b32.xlu0 %v314_v5, %s935_s15 }
  0x3a   : > { %447 = vrot.lane.b32.xlu1 %v333_v2, %s938_s18  ;;  %427 = vrot.lane.b32.xlu0 %v314_v5, %s937_s17 }
  0x3e   : > { %445 = vrot.lane.b32.xlu1 %v310_v1, %s938_s18  ;;  %449 = vrot.lane.b32.xlu0 %v441_v10, %s938_s18 }
  0x42   : > { %554 = vperm.xlu0 %880, %v551_v13   ;;  %562 = vperm.xlu1 %881, %v559_v14   ;;  %v577_v13 = vsub.s32 1, %v572_v7 }
  0x84   : > { %v339_v15 = vpop.permute.xlu1 %338  ;;  %v319_v16 = vpop.permute.xlu0 %318 }
  0x88   : > { %v337_v17 = vpop.permute.xlu1 %336  ;;  %v356_v18 = vpop.permute.xlu0 %355 }
  0x89   : > { %v342_v19 = vsel %vm340_vm0, %v337_v17, %v339_v15 }
  0x8a   : > { %346 = vst [vmem:[#allocation2 + $0x18] sm:$0xf] %v342_v19 }
  0x8c   : > { %v358_v20 = vpop.permute.xlu1 %357  ;;  %v321_v21 = vpop.permute.xlu0 %320 }
  0x8d   : > { %v361_v22 = vsel %vm359_vm1, %v356_v18, %v358_v20  ;;  %v324_v23 = vsel %vm322_vm2, %v319_v16, %v321_v21  ;;  %v578_v20 = vrot.slane %v569_v12, %v577_v13 }
  0x8e   : > { %365 = vst [vmem:[#allocation2 + $0x18] sm:$0xf0] %v361_v22  ;;  %328 = vst [vmem:[#allocation2 + $0x8] sm:$0xf0] %v324_v23  ;;  %v941_v22 = vmov 0.0|0.0  }
  0x8f   : > { %847 = vmatprep.subr.bf16.mxu1 %v941_v22 }
  0x90   : > { %v335_v24 = vpop.permute.xlu1 %334  ;;  %v317_v25 = vpop.permute.xlu0 %316 }
  0x91   : > { %v341_v26 = vsel %vm340_vm0, %v335_v24, %v337_v17  ;;  %v323_v27 = vsel %vm322_vm2, %v317_v25, %v319_v16 }
  0x92   : > { %345 = vst [vmem:[#allocation2 + $0x10] sm:$0xf] %v341_v26  ;;  %327 = vst [vmem:[#allocation2] sm:$0xf0] %v323_v27 }
  0x94   : > { %v374_v28 = vpop.permute.xlu1 %373  ;;  %v354_v29 = vpop.permute.xlu0 %353 }
  0x95   : > { %v360_v30 = vsel %vm359_vm1, %v354_v29, %v356_v18  ;;  %v460_v31 = vld [vmem:[#allocation2 + $0x8] sm:$0xff]  ;;  %v462_v32 = vld [vmem:[#allocation2 + $0x18] sm:$0xff]  ;;  %v574_v18 = vrot.slane %v569_v12, %v573_v9  ;;  %v733_v29 = vld [vmem:[%s1107_s6] sm:$0xff] }
  0x96   : > { %364 = vst [vmem:[#allocation2 + $0x10] sm:$0xf0] %v360_v30  ;;  %v839_v33 = vpack.c.bf16 %v462_v32, %v460_v31 }
  0x98   : > { %v393_v34 = vpop.permute.xlu1 %392  ;;  %v376_v35 = vpop.permute.xlu0 %375  ;;  %840 = vmatprep.subr.bf16.mxu0 %v839_v33 }
  0x99   : > { %v379_v36 = vsel %vm377_vm3, %v374_v28, %v376_v35  ;;  %v459_v40 = vld [vmem:[#allocation2] sm:$0xff] }
  0x9a   : > { %383 = vst [vmem:[#allocation2 + $0x28] sm:$0xf] %v379_v36 }
  0x9c   : > { %v411_v37 = vpop.permute.xlu1 %410  ;;  %v395_v38 = vpop.permute.xlu0 %394 }
  0x9d   : > { %v398_v39 = vsel %vm396_vm4, %v393_v34, %v395_v38  ;;  %v461_v41 = vld [vmem:[#allocation2 + $0x10] sm:$0xff] }
  0x9e   : > { %402 = vst [vmem:[#allocation2 + $0x28] sm:$0xf0] %v398_v39  ;;  %v841_v42 = vpack.c.bf16 %v461_v41, %v459_v40 }
  0xa0   : > { %v430_v43 = vpop.permute.xlu1 %429  ;;  %v413_v44 = vpop.permute.xlu0 %412  ;;  %842 = vmatpush1.bf16.msra.mxu0 %v841_v42 }
  0xa1   : > { %v416_v45 = vsel %vm414_vm5, %v411_v37, %v413_v44 }
  0xa2   : > { %420 = vst [vmem:[#allocation2 + $0x38] sm:$0xf] %v416_v45 }
  0xa4   : > { %v372_v46 = vpop.permute.xlu1 %371  ;;  %v432_v47 = vpop.permute.xlu0 %431 }
  0xa5   : > { %v378_v48 = vsel %vm377_vm3, %v372_v46, %v374_v28  ;;  %v435_v49 = vsel %vm433_vm6, %v430_v43, %v432_v47  ;;  %v464_v57 = vld [vmem:[#allocation2 + $0x28] sm:$0xff]  ;;  %v726_v28 = vld [vmem:[%s1106_s5] sm:$0xff] }
  0xa6   : > { %382 = vst [vmem:[#allocation2 + $0x20] sm:$0xf] %v378_v48  ;;  %439 = vst [vmem:[#allocation2 + $0x38] sm:$0xf0] %v435_v49 }
  0xa8   : > { %v409_v50 = vpop.permute.xlu1 %408  ;;  %v391_v51 = vpop.permute.xlu0 %390 }
  0xa9   : > { %v415_v52 = vsel %vm414_vm5, %v409_v50, %v411_v37  ;;  %v397_v53 = vsel %vm396_vm4, %v391_v51, %v393_v34 }
  0xaa   : > { %419 = vst [vmem:[#allocation2 + $0x30] sm:$0xf] %v415_v52  ;;  %401 = vst [vmem:[#allocation2 + $0x20] sm:$0xf0] %v397_v53 }
  0xac   : > { %v448_v54 = vpop.permute.xlu1 %447  ;;  %v428_v55 = vpop.permute.xlu0 %427 }
  0xad   : > { %v434_v56 = vsel %vm433_vm6, %v428_v55, %v430_v43  ;;  %v466_v58 = vld [vmem:[#allocation2 + $0x38] sm:$0xff] }
  0xae   : > { %438 = vst [vmem:[#allocation2 + $0x30] sm:$0xf0] %v434_v56  ;;  %v843_v59 = vpack.c.bf16 %v466_v58, %v464_v57 }
  0xb0   : > { %v446_v60 = vpop.permute.xlu1 %445  ;;  %v450_v61 = vpop.permute.xlu0 %449  ;;  %844 = vmatprep.subr.bf16.mxu0 %v843_v59 }
  0xb1   : > { %v452_v62 = vsel %vm451_vm7, %v446_v60, %v448_v54  ;;  %v453_v63 = vsel %vm451_vm7, %v448_v54, %v450_v61  ;;  %v463_v0 = vld [vmem:[#allocation2 + $0x20] sm:$0xff] }
  0xb2   : > { %456 = vst [vmem:[#allocation2 + $0x40] sm:$0xf] %v452_v62  ;;  %457 = vst [vmem:[#allocation2 + $0x48] sm:$0xf] %v453_v63 }
  0xb5   : > { %v465_v1 = vld [vmem:[#allocation2 + $0x30] sm:$0xff] }
  0xb6   : > { %v845_v2 = vpack.c.bf16 %v465_v1, %v463_v0  ;;  %v642_v0 = vld [vmem:[%s1105_s4] sm:$0xff] }
  0xb8   : > { %846 = vmatpush1.bf16.msra.mxu0 %v845_v2 }
  0xb9   : > { %v468_v3 = vld [vmem:[#allocation2 + $0x48] sm:$0xf]  ;;  %v467_v5 = vld [vmem:[#allocation2 + $0x40] sm:$0xf] }
  0xba   : > { %802 = vmatprep.subr.msk.mxu0 %vm473_vm8, %v468_v3 }
  0xbc   : > { %803 = vmatpush1.msk.msra.mxu0 %vm473_vm8, %v467_v5 }
  0xbd   : > { %804 = vmatmul.mubr.msk.f32.vlgmr.msra.gmra.mrb[0].mxu0 %vm469_vm9, %v458_v4 }
  0xc1   : > { %v555_v8 = vpop.permute.xlu0 %554  ;;  %v563_v14 = vpop.permute.xlu1 %562 }
 0x190   : > { %v546_v10 = vpop.f32.mrb[0].mxu0 }
 0x191   : > { %v557_v15 = vmul.f32 %v555_v8, %v546_v10  ;;  %v548_v16 = vpop.f32.mrb[1].mxu0 }
 0x192   : > { %v558_v17 = vmul.f32 %v555_v8, %v548_v16 }
 0x193   : > { %v565_v19 = vadd.f32 %v563_v14, %v557_v15 }
 0x194   : > { %v566_v21 = vadd.f32 %v563_v14, %v558_v17 }
 0x195   : > { %v567_v23 = vmax.f32 %v565_v19, 0.0 }
 0x196   : > { %v568_v24 = vmax.f32 %v566_v21, 0.0 }
 0x197   : > { %v581_v25 = vmul.f32 %v574_v18, %v567_v23 }
 0x198   : > { %v582_v26 = vmul.f32 %v578_v20, %v568_v24 }
 0x19a   : > { %v887_v27 = vpack.i.bf16 %v582_v26, %v581_v25 }
 0x19c   : > { %888 = vrot.lane.b32.xlu0 %v887_v27, %s931_s11  ;;  %883 = vrot.lane.b32.xlu1 %v887_v27, %s932_s12 }
 0x1a0   : > { %898 = vrot.lane.b32.xlu0 %v887_v27, %s934_s14  ;;  %893 = vrot.lane.b32.xlu1 %v887_v27, %s933_s13  ;;  %s801_s13 = sshll.u32 %s1111_s28, 3 }
 0x1a4   : > { %908 = vrot.lane.b32.xlu0 %v887_v27, %s936_s16  ;;  %903 = vrot.lane.b32.xlu1 %v887_v27, %s935_s15  ;;  %s303_s16 = scalar_lea.vmem %s1109_s8, %s801_s13 }
 0x1a8   : > { %635 = vrot.lane.b32.xlu0 %v581_v25, %s938_s18  ;;  %913 = vrot.lane.b32.xlu1 %v887_v27, %s937_s17 }
 0x1ac   : > { %729 = vperm.xlu0 %880, %v726_v28   ;;  %637 = vrot.lane.b32.xlu1 %v582_v26, %s938_s18 }
 0x1b0   : > { %736 = vperm.xlu1 %881, %v733_v29  }
 0x20e   : > { %v889_v30 = vpop.permute.xlu0 %888  ;;  %v884_v31 = vpop.permute.xlu1 %883 }
 0x20f   : > { %v886_v32 = vunpack.i.h.bf16 %v884_v31  ;;  %v885_v33 = vunpack.i.l.bf16 %v884_v31  ;;  %v891_v34 = vunpack.i.h.bf16 %v889_v30  ;;  %v890_v35 = vunpack.i.l.bf16 %v889_v30 }
 0x211   : > { %v590_v36 = vsel %vm322_vm2, %v885_v33, %v886_v32  ;;  %v597_v44 = vsel %vm340_vm0, %v890_v35, %v891_v34 }
 0x212   : > { %v899_v37 = vpop.permute.xlu0 %898  ;;  %v894_v38 = vpop.permute.xlu1 %893  ;;  %v848_v39 = vpack.c.bf16 %v590_v36, %v581_v25 }
 0x213   : > { %v896_v40 = vunpack.i.h.bf16 %v894_v38  ;;  %v895_v41 = vunpack.i.l.bf16 %v894_v38  ;;  %v901_v42 = vunpack.i.h.bf16 %v899_v37  ;;  %v900_v43 = vunpack.i.l.bf16 %v899_v37 }
 0x214   : > { %849 = vmatpush3.bf16.msra.mxu1 %v848_v39 }
 0x215   : > { %850 = vmatprep.subr.bf16.mxu1 %v941_v22  ;;  %v604_v45 = vsel %vm359_vm1, %v895_v41, %v896_v40  ;;  %v611_v53 = vsel %vm377_vm3, %v900_v43, %v901_v42 }
 0x216   : > { %v909_v46 = vpop.permute.xlu0 %908  ;;  %v904_v47 = vpop.permute.xlu1 %903  ;;  %v851_v48 = vpack.c.bf16 %v604_v45, %v597_v44 }
 0x217   : > { %v906_v49 = vunpack.i.h.bf16 %v904_v47  ;;  %v905_v50 = vunpack.i.l.bf16 %v904_v47  ;;  %v911_v51 = vunpack.i.h.bf16 %v909_v46  ;;  %v910_v52 = vunpack.i.l.bf16 %v909_v46 }
 0x218   : > { %852 = vmatpush3.bf16.msra.mxu1 %v851_v48 }
 0x219   : > { %853 = vmatprep.subr.bf16.mxu1 %v941_v22  ;;  %v618_v54 = vsel %vm396_vm4, %v905_v50, %v906_v49  ;;  %v625_v59 = vsel %vm414_vm5, %v910_v52, %v911_v51 }
 0x21a   : > { %v914_v55 = vpop.permute.xlu1 %913  ;;  %v854_v56 = vpack.c.bf16 %v618_v54, %v611_v53  ;;  %v636_v63 = vpop.permute.xlu0 %635 }
 0x21b   : > { %v916_v57 = vunpack.i.h.bf16 %v914_v55  ;;  %v915_v58 = vunpack.i.l.bf16 %v914_v55 }
 0x21c   : > { %855 = vmatpush3.bf16.msra.mxu1 %v854_v56 }
 0x21d   : > { %856 = vmatprep.subr.bf16.mxu1 %v941_v22  ;;  %v632_v60 = vsel %vm433_vm6, %v915_v58, %v916_v57 }
 0x21e   : > { %v857_v61 = vpack.c.bf16 %v632_v60, %v625_v59  ;;  %v638_v62 = vpop.permute.xlu1 %637 }
 0x21f   : > { %v639_v1 = vsel %vm451_vm7, %v636_v63, %v638_v62 }
 0x220   : > { %858 = vmatpush3.bf16.msra.mxu1 %v857_v61 }
 0x221   : > { %834 = vmatprep.subr.mxu1 %v939_v11 }
 0x224   : > { %835 = vmatpush3.msra.mxu1 %v639_v1 }
 0x225   : > { %837 = vmatmul.mubr.msk.f32.vlgmr.msra.gmra.mrb[0].mxu1 %vm652_vm11, %v642_v0 }
 0x22b   : > { %v730_v2 = vpop.permute.xlu0 %729 }
 0x22f   : > { %v737_v6 = vpop.permute.xlu1 %736 }
 0x2f8   : > { %v722_v3 = vpop.f32.mrb[0].mxu1 }
 0x2f9   : > { %v732_v4 = vmul.f32 %v730_v2, %v722_v3  ;;  %v838_v5 = vpop.f32.mrb[1].mxu1 }
 0x2fb   : > { %v739_v7 = vadd.f32 %v737_v6, %v732_v4 }
 0x2fd   : > { %v740_v11 = vmax.f32 %v739_v7, 0.0 }
 0x2ff   : > { %741 = vst [vmem:[%s303_s16] sm:$0xff] %v740_v11 }
 0x300 PF: > { %s18_s27 = sadd.s32 1, %s929_s27  }
 0x301   : > { %p15_p4 = scmp.ge.s32.totalorder %s18_s27, 4  }
 0x303   :  { %17 = sbr.rel (!%p15_p4) target bundleno = 1 (0x1), region = 82 }

</bundles_post_ra>
